<compile_context>
chip_gen: v7x
topology: tpu7x:2x2x1
jax: 0.10.0
libtpu: 0.0.40
codegen_flags: <defaults>
</compile_context>

<pallas_src>
import functools

import jax
import jax.numpy as jnp
from jax.experimental import pallas as pl
from jax.experimental.pallas import tpu as pltpu

_LANE = 128
_SUBLANE = 8
_NEG_BIG = -1e30  # baked into the gate bias for padded lanes (avoids inf-inf)


def _round_up(x, m):
    return ((x + m - 1) // m) * m


def _feature_pad(e_real):
    """Lane padding policy: pad only when it pays off.

    - e_real multiple of 128: already lane-dense, no padding.
    - e_real < 128: full-dim blocks (masked stores) beat 4x padded HBM traffic.
    - otherwise: pad up to the next multiple of 128.
    """
    if e_real % _LANE == 0 or e_real < _LANE:
        return e_real
    return _round_up(e_real, _LANE)


def _vmem_cap_bytes():
    """Generation-aware scoped-VMEM cap (~75% of physical VMEM)."""
    try:
        cap = int(pltpu.get_tpu_info().vmem_capacity_bytes)
    except Exception:  # conservative fallback: v7x per-TC VMEM
        cap = 64 << 20
    return max((cap * 3) // 4, 16 << 20)


def _make_highway_kernel(e_pad, compute_dtype):
    """Kernel over one (tile_n, E_pad) batch tile; fused weights VMEM-resident."""

    def kernel(x_ref, w_ref, b_ref, o_ref):
        x = x_ref[...]                                   # (tile_n, E_pad)
        x_f32 = x.astype(jnp.float32)                    # residual path stays f32
        xm = x.astype(compute_dtype)                     # matmul operand only

        # Single fused MXU pass: (tile_n, E_pad) @ (E_pad, 2*E_pad), f32 acc.
        fused = jnp.dot(xm, w_ref[...], preferred_element_type=jnp.float32)
        fused = fused + b_ref[...]                       # bias (1, 2*E_pad), f32
                                                         # (padded gate lanes = -1e30)

        # proj half: Linear + ReLU (clamp(min=0))
        proj = jnp.maximum(fused[:, :e_pad], 0.0)

        # gate half: Linear + softmax over the feature axis.
        logits = fused[:, e_pad:]
        m = jnp.max(logits, axis=-1, keepdims=True)
        ex = jnp.exp(logits - m)
        gate = ex / jnp.sum(ex, axis=-1, keepdims=True)  # exact divide (denom (tile_n,1))

        # highway mix: gate*proj + (1-gate)*x  ==  x + gate*(proj - x)
        o_ref[...] = (x_f32 + gate * (proj - x_f32)).astype(o_ref.dtype)

    return kernel


def prepare_highway_params(w_proj, b_proj, w_gate, b_gate, *,
                           compute_dtype=jnp.float32):
    """One-time prep: transpose to (in, out), fuse proj|gate, lane-pad, cast.

    Returns
      w_fused: (E_pad, 2*E_pad) compute_dtype; cols [0:E_pad] proj, [E_pad:] gate
      b_fused: (1, 2*E_pad) f32; padded gate lanes pre-set to -1e30 (mask baked in)
    """
    e = w_proj.shape[0]
    e_pad = _feature_pad(e)

    wp = jnp.zeros((e_pad, e_pad), jnp.float32).at[:e, :e].set(
        jnp.asarray(w_proj, jnp.float32).T)
    wg = jnp.zeros((e_pad, e_pad), jnp.float32).at[:e, :e].set(
        jnp.asarray(w_gate, jnp.float32).T)
    w_fused = jnp.concatenate([wp, wg], axis=1).astype(compute_dtype)

    b_fused = jnp.zeros((1, 2 * e_pad), jnp.float32)
    b_fused = b_fused.at[0, :e].set(jnp.asarray(b_proj, jnp.float32))
    b_fused = b_fused.at[0, e_pad:e_pad + e].set(jnp.asarray(b_gate, jnp.float32))
    if e_pad != e:
        # Bake the softmax lane mask into the bias: padded gate logits -> -1e30.
        b_fused = b_fused.at[0, e_pad + e:].set(_NEG_BIG)
    return w_fused, b_fused


@functools.partial(jax.jit, static_argnames=("max_tile_n", "out_dtype"))
def highway_forward(x, w_fused, b_fused, *, max_tile_n=1024, out_dtype=None):
    """x: (N, E) unpadded; w_fused/b_fused from prepare_highway_params."""
    n, e_real = x.shape
    e_pad = w_fused.shape[0]
    assert w_fused.shape == (e_pad, 2 * e_pad)
    assert b_fused.shape == (1, 2 * e_pad)
    out_dtype = jnp.dtype(out_dtype) if out_dtype is not None else x.dtype
    compute_dtype = w_fused.dtype

    # Feature padding only when the prepared weights were padded: a single
    # jnp.pad in x's own dtype (no pad-to-f32 copy + cast passes).
    x_in = x if e_pad == e_real else jnp.pad(x, ((0, 0), (0, e_pad - e_real)))

    itemsize_x = jnp.dtype(x_in.dtype).itemsize
    itemsize_w = jnp.dtype(compute_dtype).itemsize
    itemsize_o = jnp.dtype(out_dtype).itemsize

    # --- tile_n from a generation-aware VMEM budget --------------------------
    vmem_cap = _vmem_cap_bytes()
    # Conservative bookkeeping: resident fused weight/bias (counted twice in
    # case the default pipeline double-buffers constant-index blocks),
    # double-buffered x/out tiles, f32 (tile_n, 2*E_pad) fused temp + epilogue.
    resident = 2 * (e_pad * 2 * e_pad * itemsize_w + 2 * e_pad * 4)
    per_row = (2 * e_pad * itemsize_x        # x tile, double-buffered
               + 2 * e_pad * itemsize_o      # out tile, double-buffered
               + 2 * e_pad * 4               # fused f32 temp
               + 4 * e_pad * 4)              # proj / logits / ex / gate temps
    budget = max(vmem_cap - resident, 1 << 20)
    tile_cap = max(_SUBLANE, min(max_tile_n, budget // per_row))
    # Balance tiles over a cdiv grid: no batch padding, no round_up(n, tile_n)
    # ~2x-waste pathology for unlucky N; ragged last tile is masked by Pallas.
    num_tiles = pl.cdiv(n, tile_cap)
    tile_n = min(_round_up(pl.cdiv(n, num_tiles), _SUBLANE),
                 _round_up(n, _SUBLANE))
    grid = (pl.cdiv(n, tile_n),)

    cost = pl.CostEstimate(
        flops=2 * n * e_pad * 2 * e_pad + 10 * n * e_pad,
        transcendentals=n * e_pad,
        bytes_accessed=(x_in.size * itemsize_x
                        + w_fused.size * itemsize_w
                        + b_fused.size * 4
                        + n * e_pad * itemsize_o),
    )

    out = pl.pallas_call(
        _make_highway_kernel(e_pad, compute_dtype),
        out_shape=jax.ShapeDtypeStruct((n, e_pad), out_dtype),
        grid=grid,
        in_specs=[
            pl.BlockSpec((tile_n, e_pad), lambda i: (i, 0)),      # x tile (pipelined)
            pl.BlockSpec((e_pad, 2 * e_pad), lambda i: (0, 0)),   # fused W (resident)
            pl.BlockSpec((1, 2 * e_pad), lambda i: (0, 0)),       # fused bias (resident)
        ],
        out_specs=pl.BlockSpec((tile_n, e_pad), lambda i: (i, 0)),
        compiler_params=pltpu.CompilerParams(
            dimension_semantics=("parallel",),                    # v7x: shard over 2 TCs
            vmem_limit_bytes=int(vmem_cap),
        ),
        cost_estimate=cost,
    )(x_in, w_fused, b_fused)

    return out if e_pad == e_real else out[:, :e_real]


def highway_reference(x, w_proj, b_proj, w_gate, b_gate):
    hi = jax.lax.Precision.HIGHEST
    proj = jnp.maximum(jnp.dot(x, w_proj.T, precision=hi) + b_proj, 0.0)
    gate = jax.nn.softmax(jnp.dot(x, w_gate.T, precision=hi) + b_gate, axis=1)
    return gate * proj + (1.0 - gate) * x


if __name__ == "__main__":
    key = jax.random.PRNGKey(0)
    batch, e_word = 8, 32

    k_x, k_wp, k_bp, k_wg, k_bg = jax.random.split(key, 5)
    x = jax.random.normal(k_x, (batch, e_word), dtype=jnp.float32)

    # nn.Linear(e_word, e_word, bias=True)-shaped parameters
    bound = 1.0 / float(e_word) ** 0.5
    w_proj = jax.random.uniform(k_wp, (e_word, e_word), jnp.float32, -bound, bound)
    b_proj = jax.random.uniform(k_bp, (e_word,), jnp.float32, -bound, bound)
    w_gate = jax.random.uniform(k_wg, (e_word, e_word), jnp.float32, -bound, bound)
    b_gate = jax.random.uniform(k_bg, (e_word,), jnp.float32, -bound, bound)

    ref = highway_reference(x, w_proj, b_proj, w_gate, b_gate)

    # f32 path (exact-divide softmax -> tight tolerance)
    w_f32, b_f32 = prepare_highway_params(w_proj, b_proj, w_gate, b_gate,
                                          compute_dtype=jnp.float32)
    out_f32 = jax.block_until_ready(highway_forward(x, w_f32, b_f32))
    assert out_f32.shape == (batch, e_word)
    assert jnp.allclose(out_f32, ref, atol=1e-4, rtol=1e-4), "f32 kernel mismatch"

    # bf16 weights / matmul-operand path (recommended default on v6e/v7x);
    # residual mix stays f32 inside the kernel, MXU accumulates in f32.
    w_bf16, b_bf16 = prepare_highway_params(w_proj, b_proj, w_gate, b_gate,
                                            compute_dtype=jnp.bfloat16)
    out_bf16 = jax.block_until_ready(highway_forward(x, w_bf16, b_bf16))
    assert out_bf16.shape == (batch, e_word)
    assert jnp.allclose(out_bf16, ref, atol=3e-2, rtol=3e-2), "bf16 kernel mismatch"

    print("KERNEL_OK")
</pallas_src>

<mosaic_0001>
module attributes {stable_mosaic.version = 11 : i64} {
  func.func @kernel(%arg0: i32, %arg1: memref<8x32xf32, #tpu.memory_space<vmem>>, %arg2: memref<32x64xf32, #tpu.memory_space<vmem>>, %arg3: memref<1x64xf32, #tpu.memory_space<vmem>>, %arg4: memref<8x32xf32, #tpu.memory_space<vmem>>) attributes {dimension_semantics = [#tpu.dimension_semantics<parallel>], iteration_bounds = array<i64: 1>, scalar_prefetch = 0 : i64, scratch_operands = 0 : i64, tpu.core_type = #tpu.core_type<tc>, window_params = [{transform_indices = @transform_0, window_bounds = array<i64: 8, 32>}, {pipeline_mode = #tpu.pipeline_mode<synchronous>, transform_indices = @transform_1, window_bounds = array<i64: 32, 64>}, {pipeline_mode = #tpu.pipeline_mode<synchronous>, transform_indices = @transform_2, window_bounds = array<i64: 1, 64>}, {transform_indices = @transform_3, window_bounds = array<i64: 8, 32>}]} {
    %c0 = arith.constant 0 : index
    %c0_0 = arith.constant 0 : index
    %0 = vector.load %arg1[%c0, %c0_0] : memref<8x32xf32, #tpu.memory_space<vmem>>, vector<8x32xf32>
    %c0_1 = arith.constant 0 : index
    %c0_2 = arith.constant 0 : index
    %1 = vector.load %arg2[%c0_1, %c0_2] : memref<32x64xf32, #tpu.memory_space<vmem>>, vector<32x64xf32>
    %cst = arith.constant dense<0.000000e+00> : vector<8x64xf32>
    %2 = tpu.matmul %0, %1, %cst {dimension_numbers = #tpu.dot_dimension_numbers<[1], [0], [0], [1], [0, 0, 1, 1], [], []>} : vector<8x32xf32>, vector<32x64xf32>, vector<8x64xf32> -> vector<8x64xf32>
    %c0_3 = arith.constant 0 : index
    %c0_4 = arith.constant 0 : index
    %3 = vector.load %arg3[%c0_3, %c0_4] : memref<1x64xf32, #tpu.memory_space<vmem>>, vector<1x64xf32>
    %4 = vector.broadcast %3 : vector<1x64xf32> to vector<8x64xf32>
    %5 = arith.addf %2, %4 : vector<8x64xf32>
    %6 = vector.extract_strided_slice %5 {offsets = [0, 0], sizes = [8, 32], strides = [1, 1]} : vector<8x64xf32> to vector<8x32xf32>
    %cst_5 = arith.constant 0.000000e+00 : f32
    %7 = vector.broadcast %cst_5 : f32 to vector<8x32xf32>
    %8 = arith.maximumf %6, %7 : vector<8x32xf32>
    %9 = vector.extract_strided_slice %5 {offsets = [0, 32], sizes = [8, 32], strides = [1, 1]} : vector<8x64xf32> to vector<8x32xf32>
    %cst_6 = arith.constant dense<0xFF800000> : vector<8xf32>
    %10 = vector.multi_reduction <maximumf>, %9, %cst_6 [1] : vector<8x32xf32> to vector<8xf32>
    %11 = vector.shape_cast %10 : vector<8xf32> to vector<8x1xf32>
    %12 = vector.broadcast %11 : vector<8x1xf32> to vector<8x32xf32>
    %13 = arith.subf %9, %12 : vector<8x32xf32>
    %14 = math.exp %13 : vector<8x32xf32>
    %cst_7 = arith.constant dense<0.000000e+00> : vector<8xf32>
    %15 = vector.multi_reduction <add>, %14, %cst_7 [1] : vector<8x32xf32> to vector<8xf32>
    %16 = vector.shape_cast %15 : vector<8xf32> to vector<8x1xf32>
    %17 = vector.broadcast %16 : vector<8x1xf32> to vector<8x32xf32>
    %18 = arith.divf %14, %17 : vector<8x32xf32>
    %19 = arith.subf %8, %0 : vector<8x32xf32>
    %20 = arith.mulf %18, %19 : vector<8x32xf32>
    %21 = arith.addf %0, %20 : vector<8x32xf32>
    %c0_8 = arith.constant 0 : index
    %c0_9 = arith.constant 0 : index
    %22 = vector.load %arg4[%c0_8, %c0_9] : memref<8x32xf32, #tpu.memory_space<vmem>>, vector<8x32xf32>
    tpu.vector_store %arg4[%c0_8, %c0_9], %21 {strides = array<i32>} : memref<8x32xf32, #tpu.memory_space<vmem>>, vector<8x32xf32>,
    return
  }
  func.func @transform_0(%arg0: i32) -> (i32, i32) {
    %c0_i32 = arith.constant 0 : i32
    %c0_i32_0 = arith.constant 0 : i32
    return %arg0, %c0_i32 : i32, i32
  }
  func.func @transform_1(%arg0: i32) -> (i32, i32) {
    %c0_i32 = arith.constant 0 : i32
    %c0_i32_0 = arith.constant 0 : i32
    %c0_i32_1 = arith.constant 0 : i32
    return %c0_i32, %c0_i32_0 : i32, i32
  }
  func.func @transform_2(%arg0: i32) -> (i32, i32) {
    %c0_i32 = arith.constant 0 : i32
    %c0_i32_0 = arith.constant 0 : i32
    %c0_i32_1 = arith.constant 0 : i32
    return %c0_i32, %c0_i32_0 : i32, i32
  }
  func.func @transform_3(%arg0: i32) -> (i32, i32) {
    %c0_i32 = arith.constant 0 : i32
    %c0_i32_0 = arith.constant 0 : i32
    return %arg0, %c0_i32 : i32, i32
  }
}

</mosaic_0001>

<bundles_post_ra>
// kernel: highway_forward.1
= control target key start
LH: loop header
LB: loop body
LE: loop exit
PB: predicated region body
PF: predicated region fallthrough
CT: control target
= control target key end

     0   :  { %8 = vsyncpa [#allocation3], 0  ;;  %s361_s0 = inlined_call_operand.hbm [shape: f32[8,32], index: 0, kind: input, shape index: {}]   ;;  %s362_s1 = inlined_call_operand.hbm [shape: f32[32,64], index: 1, kind: input, shape index: {}]   ;;  %s363_s2 = inlined_call_operand.vmem [shape: f32[1,64], index: 2, kind: input, shape index: {}]   ;;  %s364_s3 = inlined_call_operand.hbm [shape: f32[8,32], index: 3, kind: output, shape index: {}]  }
   0x1   :  { %9 = vsyncpa [#allocation6], 0 }
   0x2   :  { %10 = vsyncpa [#allocation4], 0  ;;  %s282_s12 = smov [#allocation2]   ;;  %s283_s14 = smov [#allocation5]  }
   0x3   :  { %s17_s13 = sshll.u32 %s282_s12, 4  ;;  %s26_s15 = sshll.u32 %s283_s14, 4  ;;  %s18_s13 = int_to_ptr.vmem [resolvable:$true] %s17_s13  ;;  %s312_s15 = int_to_ptr.vmem [resolvable:$true] %s26_s15 }
   0x4   :  { %s210_s18 = scalar_lea.hbm %s361_s0, 128 }
   0x5   :  { %p211_p0 = scmp.ne.s32.totalorder %s361_s0, %s210_s18  ;;  %p214_p1 = scmp.lt.u32.totalorder %s210_s18, %s361_s0 }
   0x7   :  { %p216_p2 = pnand %p214_p1, %p211_p0 }
   0x9   :  { %219 = shalt.err (!%p216_p2)
}
   0xa   :  { %s220_s23 = scalar_lea.vmem %s18_s13, 128  ;;  %p225_p4 = scmp.lt.s32.totalorder %s18_s13, %s18_s13 }
   0xb   :  { %p221_p3 = scmp.ne.s32.totalorder %s18_s13, %s220_s23  ;;  %p226_p5 = scmp.lt.s32.totalorder %s220_s23, %s220_s23 }
   0xd   :  { %p227_p6 = por %p226_p5, %p225_p4 }
   0xf   :  { %p228_p7 = pnand %p227_p6, %p221_p3 }
  0x11   :  { %231 = shalt.err (!%p228_p7)
}
  0x12   :  { %20 = dma.hbm_to_vmem [thread:$0]  %s361_s0, 128, %s18_s13, [#allocation3]  }
  0x13   :  { %s232_s28 = scalar_lea.hbm %s362_s1, 512 }
  0x14   :  { %p233_p8 = scmp.ne.s32.totalorder %s362_s1, %s232_s28  ;;  %p236_p9 = scmp.lt.u32.totalorder %s232_s28, %s362_s1 }
  0x16   :  { %p238_p10 = pnand %p236_p9, %p233_p8 }
  0x18   :  { %241 = shalt.err (!%p238_p10)
}
  0x19   :  { %s242_s6 = scalar_lea.vmem %s312_s15, 512  ;;  %p247_p12 = scmp.lt.s32.totalorder %s312_s15, %s312_s15 }
  0x1a   :  { %p243_p11 = scmp.ne.s32.totalorder %s312_s15, %s242_s6  ;;  %p248_p13 = scmp.lt.s32.totalorder %s242_s6, %s242_s6 }
  0x1c   :  { %p249_p0 = por %p248_p13, %p247_p12 }
  0x1e   :  { %p250_p1 = pnand %p249_p0, %p243_p11 }
  0x20   :  { %253 = shalt.err (!%p250_p1)
}
  0x21   :  { %s284_s0 = smov 128   ;;  %s285_s7 = smov 8  }
  0x22   :  { %32 = dma.hbm_to_vmem [thread:$0]  %s362_s1, 512, %s312_s15, [#allocation6], %s284_s0, %s284_s0, %s285_s7  }
  0x23   :  { %276 = dma.done.wait [#allocation3], 128  }
  0x24   :  { %277 = vsyncadd [#allocation3], 4294967168 }
  0x25   :  { %278 = dma.done.wait [#allocation6], 512  }
  0x26   :  { %279 = vsyncadd [#allocation6], 4294966784  ;;  %v286_v0 = vmov 0.0|0.0   ;;  %vm287_vm0 = vmmov 0   ;;  %v288_v1 = vmov 0.0   ;;  %v42_v2 = vld [vmem:[#allocation5] sm:$0xff] }
  0x27   :  { %190 = vmatprep.subr.bf16.mxu0 %v286_v0  ;;  %187 = vmatprep.mubr.msk.f32.mxu0 %vm287_vm0, %v288_v1  ;;  %v43_v3 = vld [vmem:[#allocation5 + $0x8] sm:$0xff]  ;;  %v44_v4 = vld [vmem:[#allocation5 + $0x10] sm:$0xff]  ;;  %v45_v6 = vld [vmem:[#allocation5 + $0x18] sm:$0xff]  ;;  %vm53_vm1 = vcmask 261120   ;;  %vm128_vm2 = vcmask 523520   ;;  %s289_s11 = smov 96  }
  0x28   :  { %v191_v5 = vpack.c.bf16 %v43_v3, %v42_v2  ;;  %v194_v7 = vpack.c.bf16 %v45_v6, %v44_v4  ;;  %v41_v8 = vld [vmem:[#allocation2] sm:$0xff]  ;;  %s291_s12 = smov [#allocation7]  }
  0x29   :  { %v172_v9 = vld [vmem:[%s363_s2] ss:$0 sm:$0xff]  ;;  %s290_s2 = smov 32   ;;  %s162_s13 = sshll.u32 %s291_s12, 4  ;;  %s163_s13 = int_to_ptr.vmem [resolvable:$true] %s162_s13 }
  0x2a   :  { %192 = vmatpush3.bf16.msra.mxu0 %v191_v5  ;;  %s254_s14 = scalar_lea.vmem %s163_s13, 128  ;;  %p259_p3 = scmp.lt.s32.totalorder %s163_s13, %s163_s13 }
  0x2b   :  { %193 = vmatprep.subr.bf16.mxu0 %v286_v0  ;;  %p255_p2 = scmp.ne.s32.totalorder %s163_s13, %s254_s14  ;;  %p260_p4 = scmp.lt.s32.totalorder %s254_s14, %s254_s14 }
  0x2d   :  { %p261_p5 = por %p260_p4, %p259_p3 }
  0x2e   :  { %195 = vmatpush3.bf16.msra.mxu0 %v194_v7 }
  0x2f   :  { %p262_p6 = pnand %p261_p5, %p255_p2 }
  0x31   :  { %188 = vmatmul.mubr.msk.f32.vlgmr.msra.gmra.mrb[0].mxu0 %vm53_vm1, %v41_v8 }
 0x104   :  { %v123_v10 = vpop.f32.mrb[0].mxu0 }
 0x105   :  { %v124_v11 = vadd.f32 %v172_v9, %v123_v10  ;;  %v189_v12 = vpop.f32.mrb[1].mxu0 }
 0x107   :  { %v129_v13 = vsel %vm128_vm2, %v124_v11, -inf  ;;  %v127_v20 = vmax.f32 %v124_v11, 0.0 }
 0x108   :  { %130 = vmax.xlane.f32.xlu0 %v129_v13 }
 0x109   :  { %v144_v21 = vsub.f32 %v127_v20, %v41_v8 }
 0x195   :  { %v131_v14 = vpop.xlane.xlu0 %130 }
 0x196   :  { %v132_v15 = vsub.f32 %v124_v11, %v131_v14 }
 0x198   :  { %v133_v16 = vmul.f32 1.442695, %v132_v15 }
 0x19a   :  { %206 = vpow2.f32 %v133_v16 }
 0x1a4   :  { %v207_v17 = vpop.eup %206 }
 0x1a5   :  { %136 = vrot.lane.b32.xlu0 %v207_v17, %s289_s11 }
 0x217   :  { %v137_v18 = vpop.permute.xlu0 %136 }
 0x218   :  { %v139_v19 = vsel %vm53_vm1, %v137_v18, 0.0 }
 0x219   :  { %140 = vadd.xlane.f32.xlu1 %v139_v19 }
 0x22a   :  { %146 = vrot.lane.b32.xlu1 %v144_v21, %s290_s2 }
 0x2a6   :  { %v141_v22 = vpop.xlane.xlu1 %140 }
 0x2a7   :  { %208 = vrcp.f32 %v141_v22 }
 0x2aa   :  { %v147_v25 = vpop.permute.xlu1 %146 }
 0x2b1   :  { %v209_v23 = vpop.eup %208 }
 0x2b2   :  { %v143_v24 = vmul.f32 %v209_v23, %v207_v17 }
 0x2b4   :  { %v149_v26 = vmul.f32 %v147_v25, %v143_v24 }
 0x2b6   :  { %151 = vrot.lane.b32.xlu1 %v149_v26, %s289_s11 }
 0x328   :  { %v152_v27 = vpop.permute.xlu1 %151 }
 0x329   :  { %v154_v28 = vadd.f32 %v152_v27, %v41_v8 }
 0x32b   :  { %155 = vst.msk [vmem:[#allocation7] sm:$0xff] %vm53_vm1, %v154_v28 }
 0x32c   :  { %265 = shalt.err (!%p262_p6)
}
 0x32d   :  { %s266_s17 = scalar_lea.hbm %s364_s3, 128 }
 0x32e   :  { %p267_p7 = scmp.ne.s32.totalorder %s364_s3, %s266_s17  ;;  %p270_p8 = scmp.lt.u32.totalorder %s266_s17, %s364_s3 }
 0x330   :  { %p272_p9 = pnand %p270_p8, %p267_p7 }
 0x332   :  { %275 = shalt.err (!%p272_p9)
}
 0x333   :  { %165 = dma.vmem_to_hbm [thread:$0]  %s163_s13, 128, %s364_s3, [#allocation4]  }
 0x334   :  { %280 = dma.done.wait [#allocation4], 128  }
 0x335   :  { %281 = vsyncadd [#allocation4], 4294967168 }
 0x336   :  { %169 = vsyncpa [#allocation3], 1 }
 0x337   :  { %170 = vsyncpa [#allocation6], 1 }
 0x338   :  { %171 = vsyncpa [#allocation4], 1 }

</bundles_post_ra>
